<compile_context>
chip_gen: v5e
topology: v5e:2x2
jax: 0.10.0
libtpu: 0.0.40
codegen_flags: <defaults>
</compile_context>

<pallas_src>
import math
from functools import partial

import jax
import jax.numpy as jnp
from jax import lax
from jax.experimental import pallas as pl
from jax.experimental.pallas import tpu as pltpu


_MASK_VALUE = -1e30  # large finite negative: exp() underflows to exactly 0
_LANES = 128         # lane width; m/l scratch kept lane-dense


def _pick_tile(n, preferred):
    for p in preferred:
        if n % p == 0:
            return p
    # TODO(synk): pad ragged sequence lengths instead of falling back to one
    # whole-sequence tile (can blow VMEM for long lengths with no nice divisor).
    return n


def _mxu_dtype(dtype, use_bf16):
    # v7x has no native f32 MXU path; bf16 operands + f32 accumulation is the
    # fast MXU path on every generation.
    if use_bf16 and dtype == jnp.float32:
        return jnp.bfloat16
    return dtype


# ---------------------------------------------------------------------------
# Fast path: flash-style online softmax; attention matrix never materialized.
# ---------------------------------------------------------------------------
def _flash_kernel(q_ref, k_ref, v_ref, o_ref, qs_sc, m_sc, l_sc, acc_sc, *,
                  scale, mask_flag, tq, tk, mxu_dtype):
    # q_ref: (1, Tq, E)   k_ref: (1, Tk, E)   v_ref: (1, Tk, D)
    qi = pl.program_id(1)
    ki = pl.program_id(2)

    @pl.when(ki == 0)
    def _init():
        # Scale Q once per q tile (hoisted out of the per-KV-step body).
        qs_sc[...] = (q_ref[0] * scale).astype(mxu_dtype)
        m_sc[...] = jnp.full_like(m_sc, -jnp.inf)
        l_sc[...] = jnp.zeros_like(l_sc)
        acc_sc[...] = jnp.zeros_like(acc_sc)

    def _update(apply_mask):
        q = qs_sc[...]                                     # (Tq, E), MXU dtype
        k = k_ref[0].astype(mxu_dtype)                     # (Tk, E)
        v = v_ref[0].astype(mxu_dtype)                     # (Tk, D)
        # QK^T without materializing a transpose: contract E on both operands.
        s = lax.dot_general(q, k, (((1,), (1,)), ((), ())),
                            preferred_element_type=jnp.float32)   # (Tq, Tk)
        if apply_mask:
            row = qi * tq + lax.broadcasted_iota(jnp.int32, s.shape, 0)
            col = ki * tk + lax.broadcasted_iota(jnp.int32, s.shape, 1)
            s = jnp.where(col > row, _MASK_VALUE, s)

        m_prev = m_sc[...]                                  # (Tq, 128)
        m_cur = jnp.max(s, axis=-1, keepdims=True)          # (Tq, 1)
        m_new = jnp.maximum(m_prev, m_cur)                  # (Tq, 128)
        alpha = jnp.exp(m_prev - m_new)                     # (Tq, 128)
        # TODO(synk): bf16 exp (EUP) could further cut exp cost on v6e/v7x.
        p = jnp.exp(s - m_new[:, :1])                       # (Tq, Tk) f32
        l_sc[...] = alpha * l_sc[...] + jnp.sum(p, axis=-1, keepdims=True)
        acc_sc[...] = alpha[:, :1] * acc_sc[...] + lax.dot_general(
            p.astype(mxu_dtype), v, (((1,), (0,)), ((), ())),
            preferred_element_type=jnp.float32)
        m_sc[...] = m_new

    if mask_flag:
        first_row = qi * tq
        last_row = qi * tq + (tq - 1)
        first_col = ki * tk
        last_col = ki * tk + (tk - 1)
        in_range = first_col <= last_row        # tile not entirely above diag
        straddles = last_col > first_row        # tile needs element-wise mask
        # Diagonal-straddling tiles: masked update.  Fully-below tiles: cheap
        # unmasked update.  Fully-above tiles: skipped entirely (and their K/V
        # DMAs are elided by the clamped index_map in the wrapper).
        pl.when(jnp.logical_and(in_range, straddles))(lambda: _update(True))
        pl.when(jnp.logical_and(in_range, jnp.logical_not(straddles)))(
            lambda: _update(False))
    else:
        _update(False)

    @pl.when(ki == pl.num_programs(2) - 1)
    def _finalize():
        inv_l = pl.reciprocal(l_sc[...], approx=True)       # (Tq, 128)
        o_ref[0] = (acc_sc[...] * inv_l[:, :1]).astype(o_ref.dtype)


# ---------------------------------------------------------------------------
# Slow path (output_attention=True): also writes the attention matrix.
# ---------------------------------------------------------------------------
def _attn_kernel(q_ref, k_ref, v_ref, o_ref, a_ref, *, scale, mask_flag, tq,
                 mxu_dtype):
    # q_ref: (1, Tq, E)   k_ref: (1, S, E)   v_ref: (1, S, D)
    qi = pl.program_id(1)
    q = (q_ref[0] * scale).astype(mxu_dtype)
    k = k_ref[0].astype(mxu_dtype)
    v = v_ref[0].astype(mxu_dtype)
    s = lax.dot_general(q, k, (((1,), (1,)), ((), ())),
                        preferred_element_type=jnp.float32)      # (Tq, S)
    if mask_flag:
        row = qi * tq + lax.broadcasted_iota(jnp.int32, s.shape, 0)
        col = lax.broadcasted_iota(jnp.int32, s.shape, 1)
        s = jnp.where(col > row, _MASK_VALUE, s)
    m = jnp.max(s, axis=-1, keepdims=True)
    e = jnp.exp(s - m)
    attn = e * pl.reciprocal(jnp.sum(e, axis=-1, keepdims=True), approx=True)
    out = lax.dot_general(attn.astype(mxu_dtype), v, (((1,), (0,)), ((), ())),
                          preferred_element_type=jnp.float32)    # (Tq, D)
    o_ref[0] = out.astype(o_ref.dtype)
    a_ref[0] = attn.astype(a_ref.dtype)


# ---------------------------------------------------------------------------
# Wrapper (matches FullAttention.forward semantics, eval-mode dropout).
# ---------------------------------------------------------------------------
def full_attention(queries, keys, values, attn_mask=None, *,
                   mask_flag=True, scale=None, output_attention=False,
                   mxu_bf16=True):
    """queries (B,L,H,E), keys (B,S,H,E), values (B,S,H,D) -> (V, A or None)."""
    if attn_mask is not None:
        # TODO(synk): explicit attention-mask tensors not supported.
        raise NotImplementedError("only the default TriangularCausalMask path")

    B, L, H, E = queries.shape
    _, S, _, D = values.shape
    scl = float(scale) if scale is not None else 1.0 / math.sqrt(E)
    in_dtype = queries.dtype
    mxu_dtype = _mxu_dtype(in_dtype, mxu_bf16)

    # Head-major layout and fold (B, H) into one leading axis so megacore
    # (v7x: 2 TCs) gets a balanced "parallel" shard even when B or H is 1/odd.
    q = jnp.transpose(queries, (0, 2, 1, 3)).reshape(B * H, L, E)
    k = jnp.transpose(keys,    (0, 2, 1, 3)).reshape(B * H, S, E)
    v = jnp.transpose(values,  (0, 2, 1, 3)).reshape(B * H, S, D)

    if not output_attention:
        tq = _pick_tile(L, (256, 128, 64, 32, 16, 8))
        tk = _pick_tile(S, (2048, 1024, 512, 256, 128, 64, 32, 16, 8))
        nq, nk = L // tq, S // tk

        if mask_flag:
            # Clamp the KV block index to the last tile this q tile actually
            # needs: skipped (above-diagonal) steps then re-reference the
            # already-resident block and Pallas elides the HBM copy.
            def kv_map(bh, i, j):
                return (bh, jnp.minimum(j, ((i + 1) * tq - 1) // tk), 0)
        else:
            def kv_map(bh, i, j):
                return (bh, j, 0)

        kernel = partial(_flash_kernel, scale=scl, mask_flag=mask_flag,
                         tq=tq, tk=tk, mxu_dtype=mxu_dtype)
        out = pl.pallas_call(
            kernel,
            out_shape=jax.ShapeDtypeStruct((B * H, L, D), in_dtype),
            grid_spec=pltpu.PrefetchScalarGridSpec(
                num_scalar_prefetch=0,
                grid=(B * H, nq, nk),
                in_specs=[
                    pl.BlockSpec((1, tq, E), lambda bh, i, j: (bh, i, 0)),
                    pl.BlockSpec((1, tk, E), kv_map),
                    pl.BlockSpec((1, tk, D), kv_map),
                ],
                out_specs=pl.BlockSpec((1, tq, D),
                                       lambda bh, i, j: (bh, i, 0)),
                scratch_shapes=[
                    pltpu.VMEM((tq, E), mxu_dtype),         # scaled Q tile
                    pltpu.VMEM((tq, _LANES), jnp.float32),  # running max m
                    pltpu.VMEM((tq, _LANES), jnp.float32),  # running denom l
                    pltpu.VMEM((tq, D), jnp.float32),       # output accumulator
                ],
            ),
            compiler_params=pltpu.CompilerParams(
                dimension_semantics=("parallel", "parallel", "arbitrary"),
                vmem_limit_bytes=32 * 1024 * 1024),
        )(q, k, v)
        V = jnp.transpose(out.reshape(B, H, L, D), (0, 2, 1, 3))  # (B,L,H,D)
        return V, None

    # output_attention=True: cap tq so the (tq, S) f32 attention block stays
    # small even on v7x's 64 MiB VMEM.
    tq = _pick_tile(L, (128, 64, 32, 16, 8))
    kernel = partial(_attn_kernel, scale=scl, mask_flag=mask_flag, tq=tq,
                     mxu_dtype=mxu_dtype)
    out, attn = pl.pallas_call(
        kernel,
        out_shape=(jax.ShapeDtypeStruct((B * H, L, D), in_dtype),
                   jax.ShapeDtypeStruct((B * H, L, S), jnp.float32)),
        grid_spec=pltpu.PrefetchScalarGridSpec(
            num_scalar_prefetch=0,
            grid=(B * H, L // tq),
            in_specs=[
                pl.BlockSpec((1, tq, E), lambda bh, i: (bh, i, 0)),
                pl.BlockSpec((1, S, E), lambda bh, i: (bh, 0, 0)),
                pl.BlockSpec((1, S, D), lambda bh, i: (bh, 0, 0)),
            ],
            out_specs=[
                pl.BlockSpec((1, tq, D), lambda bh, i: (bh, i, 0)),
                pl.BlockSpec((1, tq, S), lambda bh, i: (bh, i, 0)),
            ],
        ),
        compiler_params=pltpu.CompilerParams(
            dimension_semantics=("parallel", "parallel"),
            vmem_limit_bytes=32 * 1024 * 1024),
    )(q, k, v)
    V = jnp.transpose(out.reshape(B, H, L, D), (0, 2, 1, 3))      # (B,L,H,D)
    A = attn.reshape(B, H, L, S)
    return V, A


# ---------------------------------------------------------------------------
# Pure-JAX reference + self-test.
# ---------------------------------------------------------------------------
def _reference(queries, keys, values, *, mask_flag=True, scale=None):
    B, L, H, E = queries.shape
    S = keys.shape[1]
    scl = scale if scale is not None else 1.0 / math.sqrt(E)
    scores = jnp.einsum('blhe,bshe->bhls', queries, keys)
    if mask_flag:
        mask = jnp.triu(jnp.ones((L, S), dtype=bool), k=1)
        scores = jnp.where(mask[None, None], -jnp.inf, scores)
    A = jax.nn.softmax(scl * scores, axis=-1)
    V = jnp.einsum('bhls,bshd->blhd', A, values)
    return V, A


if __name__ == "__main__":
    # bf16-MXU runs use a looser tolerance; f32-MXU runs validate the exact
    # algorithm (causal clamp, tile skip, online softmax) tightly.
    LOOSE = dict(atol=3e-2, rtol=3e-2)
    TIGHT = dict(atol=5e-3, rtol=5e-3)

    # Case 1: small shapes, exercises both kernels (with and without A output).
    B, L, S, H, E, D = 2, 8, 8, 4, 32, 32
    kq, kk, kv = jax.random.split(jax.random.PRNGKey(0), 3)
    queries = jax.random.normal(kq, (B, L, H, E), dtype=jnp.float32)
    keys_ = jax.random.normal(kk, (B, S, H, E), dtype=jnp.float32)
    values = jax.random.normal(kv, (B, S, H, D), dtype=jnp.float32)

    V1, A1 = full_attention(queries, keys_, values,
                            mask_flag=True, output_attention=True)
    V1 = jax.block_until_ready(V1)
    A1 = jax.block_until_ready(A1)
    V1f, _ = full_attention(queries, keys_, values,
                            mask_flag=True, output_attention=False)
    V1f = jax.block_until_ready(V1f)
    V1x, _ = full_attention(queries, keys_, values, mask_flag=True,
                            output_attention=False, mxu_bf16=False)
    V1x = jax.block_until_ready(V1x)

    Vr, Ar = _reference(queries, keys_, values, mask_flag=True)
    assert jnp.allclose(V1, Vr, **LOOSE), "V (attn path) mismatch"
    assert jnp.allclose(A1, Ar, **LOOSE), "A mismatch"
    assert jnp.allclose(V1f, Vr, **LOOSE), "V (flash path) mismatch"
    assert jnp.allclose(V1x, Vr, **TIGHT), "V (flash path, f32 MXU) mismatch"

    # Case 2: multi-KV-tile flash path (3 tiles of 128) -> exercises online
    # softmax accumulation, causal DMA clamp + tile skip, straddle-only
    # masking, and the non-causal branch.
    B2, L2, H2, E2 = 1, 384, 2, 32
    kq2, kk2, kv2 = jax.random.split(jax.random.PRNGKey(1), 3)
    q2 = jax.random.normal(kq2, (B2, L2, H2, E2), dtype=jnp.float32)
    k2 = jax.random.normal(kk2, (B2, L2, H2, E2), dtype=jnp.float32)
    v2 = jax.random.normal(kv2, (B2, L2, H2, E2), dtype=jnp.float32)

    V2, _ = full_attention(q2, k2, v2, mask_flag=True, output_attention=False)
    V2 = jax.block_until_ready(V2)
    V2x, _ = full_attention(q2, k2, v2, mask_flag=True,
                            output_attention=False, mxu_bf16=False)
    V2x = jax.block_until_ready(V2x)
    V2r, _ = _reference(q2, k2, v2, mask_flag=True)
    assert jnp.allclose(V2, V2r, **LOOSE), "V (multi-tile causal) mismatch"
    assert jnp.allclose(V2x, V2r, **TIGHT), "V (multi-tile causal f32) mismatch"

    V3, _ = full_attention(q2, k2, v2, mask_flag=False, output_attention=False)
    V3 = jax.block_until_ready(V3)
    V3r, _ = _reference(q2, k2, v2, mask_flag=False)
    assert jnp.allclose(V3, V3r, **LOOSE), "V (non-causal) mismatch"

    print("KERNEL_OK")
</pallas_src>

<mosaic_0001>
module attributes {stable_mosaic.version = 11 : i64} {
  func.func @_attn_kernel(%arg0: i32, %arg1: i32, %arg2: memref<1x8x32xf32, #tpu.memory_space<vmem>>, %arg3: memref<1x8x32xf32, #tpu.memory_space<vmem>>, %arg4: memref<1x8x32xf32, #tpu.memory_space<vmem>>, %arg5: memref<1x8x32xf32, #tpu.memory_space<vmem>>, %arg6: memref<1x8x8xf32, #tpu.memory_space<vmem>>) attributes {dimension_semantics = [#tpu.dimension_semantics<parallel>, #tpu.dimension_semantics<parallel>], iteration_bounds = array<i64: 8, 1>, scalar_prefetch = 0 : i64, scratch_operands = 0 : i64, tpu.core_type = #tpu.core_type<tc>, window_params = [{transform_indices = @transform_0, window_bounds = array<i64: 1, 8, 32>}, {transform_indices = @transform_1, window_bounds = array<i64: 1, 8, 32>}, {transform_indices = @transform_2, window_bounds = array<i64: 1, 8, 32>}, {transform_indices = @transform_3, window_bounds = array<i64: 1, 8, 32>}, {transform_indices = @transform_4, window_bounds = array<i64: 1, 8, 8>}]} {
    %c0 = arith.constant 0 : index
    %c0_0 = arith.constant 0 : index
    %c0_1 = arith.constant 0 : index
    %0 = vector.load %arg2[%c0, %c0_0, %c0_1] : memref<1x8x32xf32, #tpu.memory_space<vmem>>, vector<1x8x32xf32>
    %1 = vector.shape_cast %0 : vector<1x8x32xf32> to vector<8x32xf32>
    %cst = arith.constant 0.176776692 : f32
    %2 = vector.broadcast %cst : f32 to vector<8x32xf32>
    %3 = arith.mulf %1, %2 : vector<8x32xf32>
    %4 = arith.truncf %3 : vector<8x32xf32> to vector<8x32xbf16>
    %c0_2 = arith.constant 0 : index
    %c0_3 = arith.constant 0 : index
    %c0_4 = arith.constant 0 : index
    %5 = vector.load %arg3[%c0_2, %c0_3, %c0_4] : memref<1x8x32xf32, #tpu.memory_space<vmem>>, vector<1x8x32xf32>
    %6 = vector.shape_cast %5 : vector<1x8x32xf32> to vector<8x32xf32>
    %7 = arith.truncf %6 : vector<8x32xf32> to vector<8x32xbf16>
    %c0_5 = arith.constant 0 : index
    %c0_6 = arith.constant 0 : index
    %c0_7 = arith.constant 0 : index
    %8 = vector.load %arg4[%c0_5, %c0_6, %c0_7] : memref<1x8x32xf32, #tpu.memory_space<vmem>>, vector<1x8x32xf32>
    %9 = vector.shape_cast %8 : vector<1x8x32xf32> to vector<8x32xf32>
    %10 = arith.truncf %9 : vector<8x32xf32> to vector<8x32xbf16>
    %cst_8 = arith.constant dense<0.000000e+00> : vector<8x8xf32>
    %11 = tpu.matmul %4, %7, %cst_8 {dimension_numbers = #tpu.dot_dimension_numbers<[1], [1], [0], [0], [0, 0, 1, 0], [], []>} : vector<8x32xbf16>, vector<8x32xbf16>, vector<8x8xf32> -> vector<8x8xf32>
    %c8_i32 = arith.constant 8 : i32
    %12 = arith.muli %arg1, %c8_i32 : i32
    %13 = tpu.iota {dimensions = array<i32: 0>} : vector<8x8xi32>
    %14 = vector.broadcast %12 : i32 to vector<8x8xi32>
    %15 = arith.addi %14, %13 : vector<8x8xi32>
    %16 = tpu.iota {dimensions = array<i32: 1>} : vector<8x8xi32>
    %17 = arith.cmpi sgt, %16, %15 : vector<8x8xi32>
    %cst_9 = arith.constant -1.000000e+30 : f32
    %18 = vector.broadcast %cst_9 : f32 to vector<8x8xf32>
    %19 = arith.select %17, %18, %11 : vector<8x8xi1>, vector<8x8xf32>
    %cst_10 = arith.constant dense<0xFF800000> : vector<8xf32>
    %20 = vector.multi_reduction <maximumf>, %19, %cst_10 [1] : vector<8x8xf32> to vector<8xf32>
    %21 = vector.shape_cast %20 : vector<8xf32> to vector<8x1xf32>
    %22 = vector.broadcast %21 : vector<8x1xf32> to vector<8x8xf32>
    %23 = arith.subf %19, %22 : vector<8x8xf32>
    %24 = math.exp %23 : vector<8x8xf32>
    %cst_11 = arith.constant dense<0.000000e+00> : vector<8xf32>
    %25 = vector.multi_reduction <add>, %24, %cst_11 [1] : vector<8x8xf32> to vector<8xf32>
    %26 = vector.shape_cast %25 : vector<8xf32> to vector<8x1xf32>
    %27 = tpu.reciprocal %26 {approx = true} : vector<8x1xf32> -> vector<8x1xf32>
    %28 = vector.broadcast %27 : vector<8x1xf32> to vector<8x8xf32>
    %29 = arith.mulf %24, %28 : vector<8x8xf32>
    %30 = arith.truncf %29 : vector<8x8xf32> to vector<8x8xbf16>
    %cst_12 = arith.constant dense<0.000000e+00> : vector<8x32xf32>
    %31 = tpu.matmul %30, %10, %cst_12 {dimension_numbers = #tpu.dot_dimension_numbers<[1], [0], [0], [1], [0, 0, 1, 1], [], []>} : vector<8x8xbf16>, vector<8x32xbf16>, vector<8x32xf32> -> vector<8x32xf32>
    %c0_13 = arith.constant 0 : index
    %c0_14 = arith.constant 0 : index
    %c0_15 = arith.constant 0 : index
    %32 = vector.load %arg5[%c0_13, %c0_14, %c0_15] : memref<1x8x32xf32, #tpu.memory_space<vmem>>, vector<1x8x32xf32>
    %33 = vector.shape_cast %32 : vector<1x8x32xf32> to vector<8x32xf32>
    %34 = vector.shape_cast %31 : vector<8x32xf32> to vector<1x8x32xf32>
    tpu.vector_store %arg5[%c0_13, %c0_14, %c0_15], %34 {strides = array<i32>} : memref<1x8x32xf32, #tpu.memory_space<vmem>>, vector<1x8x32xf32>,
    %c0_16 = arith.constant 0 : index
    %c0_17 = arith.constant 0 : index
    %c0_18 = arith.constant 0 : index
    %35 = vector.load %arg6[%c0_16, %c0_17, %c0_18] : memref<1x8x8xf32, #tpu.memory_space<vmem>>, vector<1x8x8xf32>
    %36 = vector.shape_cast %35 : vector<1x8x8xf32> to vector<8x8xf32>
    %37 = vector.shape_cast %29 : vector<8x8xf32> to vector<1x8x8xf32>
    tpu.vector_store %arg6[%c0_16, %c0_17, %c0_18], %37 {strides = array<i32>} : memref<1x8x8xf32, #tpu.memory_space<vmem>>, vector<1x8x8xf32>,
    return
  }
  func.func @transform_0(%arg0: i32, %arg1: i32) -> (i32, i32, i32) {
    %c0_i32 = arith.constant 0 : i32
    %c0_i32_0 = arith.constant 0 : i32
    return %arg0, %arg1, %c0_i32 : i32, i32, i32
  }
  func.func @transform_1(%arg0: i32, %arg1: i32) -> (i32, i32, i32) {
    %c0_i32 = arith.constant 0 : i32
    %c0_i32_0 = arith.constant 0 : i32
    %c0_i32_1 = arith.constant 0 : i32
    return %arg0, %c0_i32, %c0_i32_0 : i32, i32, i32
  }
  func.func @transform_2(%arg0: i32, %arg1: i32) -> (i32, i32, i32) {
    %c0_i32 = arith.constant 0 : i32
    %c0_i32_0 = arith.constant 0 : i32
    %c0_i32_1 = arith.constant 0 : i32
    return %arg0, %c0_i32, %c0_i32_0 : i32, i32, i32
  }
  func.func @transform_3(%arg0: i32, %arg1: i32) -> (i32, i32, i32) {
    %c0_i32 = arith.constant 0 : i32
    %c0_i32_0 = arith.constant 0 : i32
    return %arg0, %arg1, %c0_i32 : i32, i32, i32
  }
  func.func @transform_4(%arg0: i32, %arg1: i32) -> (i32, i32, i32) {
    %c0_i32 = arith.constant 0 : i32
    %c0_i32_0 = arith.constant 0 : i32
    return %arg0, %arg1, %c0_i32 : i32, i32, i32
  }
}

</mosaic_0001>

<bundles_post_ra>
// kernel: tpu_custom_call.1
= control target key start
LH: loop header
LB: loop body
LE: loop exit
PB: predicated region body
PF: predicated region fallthrough
CT: control target
= control target key end

     0   :  { %s1104_s0 = inlined_call_operand.hbm [shape: f32[8,8,32], index: 0, kind: input, shape index: {}]   ;;  %s1105_s1 = inlined_call_operand.hbm [shape: f32[8,8,32], index: 1, kind: input, shape index: {}]   ;;  %s1106_s2 = inlined_call_operand.hbm [shape: f32[8,8,32], index: 2, kind: input, shape index: {}]   ;;  %s1107_s3 = inlined_call_operand.hbm [shape: f32[8,8,32], index: 3, kind: output, shape index: {0}]   ;;  %s1108_s4 = inlined_call_operand.hbm [shape: f32[8,8,8], index: 4, kind: output, shape index: {1}]  }
   0x1   :  { %1112 = sst [smem:[#allocation19_spill]] %s1105_s1 }
   0x2   :  { %10 = vsyncpa [#allocation3], 0 }
   0x3   :  { %12 = vsyncpa [#allocation3 + $0x1], 0 }
   0x4   :  { %13 = vsyncpa [#allocation6], 0 }
   0x5   :  { %15 = vsyncpa [#allocation6 + $0x1], 0 }
   0x6   :  { %16 = vsyncpa [#allocation4], 0 }
   0x7   :  { %18 = vsyncpa [#allocation4 + $0x1], 0 }
   0x8   :  { %19 = vsyncpa [#allocation10], 0 }
   0x9   :  { %21 = vsyncpa [#allocation10 + $0x1], 0  ;;  %s926_s15 = smov 0   ;;  %s928_s16 = smov 0  }
   0xa   :  { %s930_s17 = smov 0   ;;  %s932_s18 = smov 0  }
   0xb   :  { %s934_s19 = smov 0   ;;  %s936_s20 = smov 0  }
   0xc LB: > { %1113 = sst [smem:[#allocation15_spill]] %s887_s17  ;;  %s957_s21 = sadd.s32 4294967295, %s899_s20   ;;  %s899_s20 = sphi %s936_s20, %s27_s20   ;;  %s895_s19 = sphi %s934_s19, %s1127_s19   ;;  %s891_s18 = sphi %s932_s18, %s1126_s18   ;;  %s887_s17 = sphi %s930_s17, %s1125_s17   ;;  %s883_s16 = sphi %s928_s16, %s1129_s16   ;;  %s879_s15 = sphi %s926_s15, %s1128_s15  }
   0xd   : > { %1114 = sst [smem:[#allocation16_spill]] %s895_s19  ;;  %s587_s22 = sadd.s32 4294967294, %s899_s20  }
   0xe   : > { %s39_s23 = sadd.s32 1, %s895_s19  ;;  %s48_s24 = sadd.s32 1, %s887_s17 }
   0xf   : > { %p41_p0 = scmp.ge.s32.totalorder %s39_s23, 8  ;;  %p55_p1 = scmp.ne.s32.totalorder %s887_s17, %s883_s16 }
  0x10   : > { %p56_p2 = scmp.eq.s32.totalorder %s899_s20, 0  ;;  %p61_p3 = scmp.ne.s32.totalorder %s883_s16, %s879_s15 }
  0x11   : > { %s1131_s23 = smov (%p41_p0, %s39_s23), 0  ;;  %p62_p5 = scmp.eq.s32.totalorder %s957_s21, 0 }
  0x12   : > { %1115 = sst [smem:[#allocation17_spill]] %s1131_s23  ;;  %p969_p4 = por %p56_p2, %p55_p1 }
  0x13   : > { %s43_s26 = ssub.s32 %s895_s19, %s1131_s23  ;;  %p139_p6 = scmp.eq.s32.totalorder %s957_s21, 7 }
  0x14   : > { %p46_p7 = scmp.eq.s32.totalorder %s43_s26, 0  ;;  %p977_p8 = por %p62_p5, %p61_p3 }
  0x15   : > { %p981_p9 = por %p139_p6, %p55_p1  ;;  %p145_p10 = scmp.eq.s32.totalorder %s587_s22, 7 }
  0x16   : > { %s986_s29 = scalar_select %p46_p7, %s887_s17, %s48_s24  }
  0x17   : > { %p988_p11 = por %p145_p10, %p61_p3  ;;  %p637_p12 = scmp.lt.s32.totalorder %s899_s20, 8 }
  0x18   : > { %1119 = sst [smem:[#allocation18_spill]] %s986_s29  ;;  %s193_s5 = sand.u32 1, %s887_s17  }
  0x19   : > { %s590_s6 = sshll.u32 %s193_s5, 3  ;;  %s591_s7 = sshll.u32 %s895_s19, 3 }
  0x1a   : > { %p997_p13 = pnand %p637_p12, %p969_p4  ;;  %s213_s9 = sand.u32 1, %s899_s20  }
  0x1b   : > { %s1122_s1 = sld [smem:[#allocation19_spill]]  ;;  %s217_s14 = scalar_lea.vmem [#allocation5], %s590_s6 }
  0x1c   : > { %s225_s22 = sshll.u32 %s217_s14, 4  ;;  %s214_s24 = scalar_lea.sflag [#allocation6], %s213_s9  ;;  %s226_s22 = int_to_ptr.vmem [resolvable:$true] %s225_s22 }
  0x1d   : > { %p596_p0 = scmp.ge.s32.totalorder %s899_s20, 1  ;;  %p249_p1 = scmp.lt.s32.totalorder %s899_s20, 9 }
  0x1e   : > { %s202_s10 = scalar_lea.hbm %s1104_s0, %s591_s7  ;;  %s194_s14 = scalar_lea.sflag [#allocation3], %s193_s5 }
  0x1f   : > { %p1009_p2 = pnand %p596_p0, %p249_p1  ;;  %s204_s11 = sshll.u32 %s202_s10, 4  ;;  %s205_s11 = int_to_ptr.hbm [resolvable:$true] %s204_s11 }
  0x20   : > { %s236_s29 = scalar_lea.vmem [#allocation7], %s590_s6  ;;  %s1026_s23 = sand.u32 (!%p1009_p2), 1, %s883_s16  }
  0x21   : > { %s221_s12 = scalar_lea.hbm %s1122_s1, %s591_s7  ;;  %s244_s17 = sshll.u32 %s236_s29, 4  ;;  %s245_s17 = int_to_ptr.vmem [resolvable:$true] %s244_s17 }
  0x22   : > { %s223_s13 = sshll.u32 %s221_s12, 4  ;;  %s197_s12 = scalar_lea.vmem [#allocation2], %s590_s6  ;;  %s224_s13 = int_to_ptr.hbm [resolvable:$true] %s223_s13 }
  0x23   : > { %626 = dma.hbm_to_vmem [thread:$0]  (!%p997_p13), %s224_s13, 128, %s226_s22, %s214_s24  }
  0x24   : > { %s206_s1 = sshll.u32 %s197_s12, 4  ;;  %s240_s22 = scalar_lea.hbm %s1106_s2, %s591_s7  ;;  %s207_s1 = int_to_ptr.vmem [resolvable:$true] %s206_s1 }
  0x25   : > { %623 = dma.hbm_to_vmem [thread:$0]  (!%p997_p13), %s205_s11, 128, %s207_s1, %s194_s14  }
  0x26   : > { %s242_s19 = sshll.u32 %s240_s22, 4  ;;  %253 = sbr.rel (%p1009_p2) target bundleno = 575 (0x23f), region = 32  ;;  %s243_s19 = int_to_ptr.hbm [resolvable:$true] %s242_s19 }
  0x27   : > { %629 = dma.hbm_to_vmem [thread:$0]  (!%p997_p13), %s243_s19, 128, %s245_s17, %s214_s24  }
  0x28   : > { %s1029_s1 = sshll.u32 (!%p1009_p2), %s1026_s23, 3  ;;  %s256_s5 = scalar_lea.sflag (!%p1009_p2), [#allocation3], %s1026_s23 }
  0x29   : > { %s259_s7 = scalar_lea.vmem (!%p1009_p2), [#allocation2], %s1029_s1 }
  0x2b   : > { %862 = dma.done.wait (%p977_p8), %s256_s5, 128  }
  0x2c   : > { %864 = vsyncadd (%p977_p8), %s256_s5, 4294967168  ;;  %s265_s17 = sand.u32 1, %s957_s21   ;;  %s269_s29 = scalar_lea.vmem [#allocation5], %s1029_s1 }
  0x2d   : > { %s266_s19 = scalar_lea.sflag [#allocation6], %s265_s17 }
  0x2e   : > { %866 = dma.done.wait (%p977_p8), %s266_s19, 256  }
  0x2f   : > { %868 = vsyncadd (%p977_p8), %s266_s19, 4294967040  ;;  %v324_v0 = vld [vmem:[%s269_s29] sm:$0xff]  ;;  %vm328_vm0 = vcmask 261120   ;;  %v321_v1 = vld [vmem:[%s259_s7] sm:$0xff]  ;;  %v349_v6 = vlaneseq  ;;  %vm357_vm2 = vcmask 64512   ;;  %s279_s21 = scalar_lea.vmem [#allocation7], %s1029_s1 }
  0x30   : > { %v325_v2 = vpack.c.bf16 %v324_v0, %v324_v0  ;;  %v322_v4 = vmul.f32 0.17677669, %v321_v1  ;;  %v326_v18 = vld [vmem:[%s279_s21] sm:$0xff]  ;;  %vm373_vm3 = vcmask 1043456   ;;  %s319_s27 = scalar_lea.vmem [#allocation9], %s1029_s1  ;;  %s606_s6 = sshll.u32 %s891_s18, 3 }
  0x31   : > { %v350_v7 = vshrl.u32 %v349_v6, 7  ;;  %v354_v8 = vand.u32 127, %v349_v6  ;;  %v327_v19 = vpack.c.bf16 %v326_v18, %v326_v18  ;;  %s424_s25 = scalar_lea.hbm %s1108_s4, %s606_s6  ;;  %s426_s26 = sshll.u32 %s319_s27, 4  ;;  %s427_s26 = int_to_ptr.vmem [resolvable:$true] %s426_s26 }
  0x32   : > { %v333_v3 = vsel %vm328_vm0, %v325_v2, 0  ;;  %v323_v5 = vpack.c.bf16 %v322_v4, %v322_v4  ;;  %s428_s10 = sshll.u32 %s424_s25, 4  ;;  %s398_s11 = scalar_lea.sflag [#allocation10], %s1026_s23  ;;  %s429_s10 = int_to_ptr.hbm [resolvable:$true] %s428_s10 }
  0x33   : > { %342 = vmatpush.bf16.xpose.msra.mxu0 %v333_v3  ;;  %vm355_vm1 = vcmp.gt.s32.totalorder %v354_v8, %v350_v7  ;;  %v375_v20 = vsel %vm373_vm3, %v327_v19, 0  ;;  %s795_s12 = sshra.s32 %s429_s10, 4  ;;  %s801_s18 = scalar_lea.hbm %s1108_s4, 64  ;;  %s796_s12 = int_to_ptr.hbm [resolvable:$true] %s795_s12 }
  0x34   : > { %384 = vmatpush.bf16.msra.mxu1 %v375_v20  ;;  %s797_s14 = scalar_lea.hbm %s796_s12, 8  ;;  %p802_p6 = scmp.lt.s32.totalorder %s796_s12, %s1108_s4 }
  0x35   : > { %p798_p3 = scmp.ne.s32.totalorder %s796_s12, %s797_s14  ;;  %p803_p7 = scmp.lt.s32.totalorder %s801_s18, %s797_s14 }
  0x37   : > { %p799_p4 = pnand %p798_p3, %p981_p9  ;;  %p804_p8 = por %p803_p7, %p802_p6 }
  0x39   : > { %p800_p5 = pneg %p799_p4 }
  0x3a   : > { %602 = vmatmul.msk.bf16.vlgmr.msra.gmra.mxu0 %vm328_vm0, %v323_v5 }
  0x3b   : > { %p805_p10 = pnand %p804_p8, %p800_p5 }
  0xb7   : > { %v344_v9 = vpop.f32.mrf.mxu0 }
  0xb8   : > { %v356_v10 = vsel %vm355_vm1, -1e+30, %v344_v9 }
  0xb9   : > { %v358_v11 = vsel %vm357_vm2, %v356_v10, -inf }
  0xba   : > { %359 = vmax.xlane.f32.xlu0 %v358_v11 }
  0xbf   : > { %v346_v12 = vpop.f32.mrf.mxu0 }
 0x12d   : > { %v360_v13 = vpop.xlane.xlu0 %359 }
 0x12e   : > { %v361_v14 = vsub.f32 %v356_v10, %v360_v13 }
 0x130   : > { %v362_v15 = vmul.f32 1.442695, %v361_v14 }
 0x132   : > { %687 = vpow2.f32 %v362_v15 }
 0x138   : > { %v688_v16 = vpop.eup %687 }
 0x139   : > { %v364_v17 = vsel %vm357_vm2, %v688_v16, 0.0 }
 0x13a   : > { %365 = vadd.xlane.f32.xlu0 %v364_v17 }
 0x1ad   : > { %v366_v21 = vpop.xlane.xlu0 %365 }
 0x1ae   : > { %689 = vrcp.f32 %v366_v21 }
 0x1b4   : > { %v690_v22 = vpop.eup %689 }
 0x1b5   : > { %v368_v23 = vmul.f32 %v690_v22, %v688_v16 }
 0x1b7   : > { %v369_v24 = vpack.c.bf16 %v368_v23, %v368_v23  ;;  %391 = vst.msk [vmem:[%s319_s27] sm:$0xff] %vm357_vm2, %v368_v23 }
 0x1b9   : > { %603 = vmatmul.msk.bf16.vlgmr.msra.gmra.mxu1 %vm357_vm2, %v369_v24 }
 0x1ba   : > { %808 = shalt.err (!%p805_p10)
}
 0x1bb   : > { %617 = dma.vmem_to_hbm [thread:$0]  (%p981_p9), %s427_s26, 128, %s429_s10, %s398_s11  }
 0x1bc   : > { %s409_s19 = scalar_lea.hbm %s1107_s3, %s606_s6  ;;  %s312_s29 = scalar_lea.vmem [#allocation8], %s1029_s1 }
 0x1bd   : > { %s411_s21 = sshll.u32 %s312_s29, 4  ;;  %s413_s27 = sshll.u32 %s409_s19, 4  ;;  %s412_s21 = int_to_ptr.vmem [resolvable:$true] %s411_s21  ;;  %s414_s27 = int_to_ptr.hbm [resolvable:$true] %s413_s27 }
 0x1be   : > { %s393_s8 = scalar_lea.sflag [#allocation4], %s1026_s23  ;;  %s823_s24 = sshra.s32 %s414_s27, 4  ;;  %s824_s24 = int_to_ptr.hbm [resolvable:$true] %s823_s24 }
 0x1bf   : > { %s825_s25 = scalar_lea.hbm %s824_s24, 8  ;;  %s829_s6 = scalar_lea.hbm %s1107_s3, 64 }
 0x1c0   : > { %p826_p12 = scmp.ne.s32.totalorder %s824_s24, %s825_s25  ;;  %p830_p1 = scmp.lt.s32.totalorder %s824_s24, %s1107_s3 }
 0x1c1   : > { %p831_p2 = scmp.lt.s32.totalorder %s829_s6, %s825_s25 }
 0x1c2   : > { %p827_p13 = pnand %p826_p12, %p981_p9 }
 0x1c3   : > { %p832_p3 = por %p831_p2, %p830_p1 }
 0x1c4   : > { %p828_p0 = pneg %p827_p13 }
 0x1c6   : > { %p833_p4 = pnand %p832_p3, %p828_p0 }
 0x236   : > { %v386_v25 = vpop.f32.mrf.mxu1 }
 0x237   : > { %390 = vst.msk [vmem:[%s312_s29] sm:$0xff] %vm328_vm0, %v386_v25 }
 0x238   : > { %836 = shalt.err (!%p833_p4)
}
 0x239   : > { %616 = dma.vmem_to_hbm [thread:$0]  (%p981_p9), %s412_s21, 128, %s414_s27, %s393_s8  }
 0x23e   : > { %v388_v26 = vpop.f32.mrf.mxu1 }
 0x23f PF: > { %p638_p5 = scmp.ge.s32.totalorder %s899_s20, 2  ;;  %s440_s23 = sand.u32 1, %s879_s15  }
 0x240   : > { %s441_s12 = scalar_lea.sflag [#allocation4], %s440_s23 }
 0x241   : > { %p631_p6 = pnand %p638_p5, %p988_p11 }
 0x243   : > { %p632_p7 = pneg %p631_p6 }
 0x245   : > { %870 = dma.done.wait (%p632_p7), %s441_s12, 128  }
 0x246   : > { %872 = vsyncadd (%p632_p7), %s441_s12, 4294967168  ;;  %s451_s14 = scalar_lea.sflag [#allocation10], %s440_s23 }
 0x247   : > { %874 = dma.done.wait (%p632_p7), %s451_s14, 128  }
 0x248   : > { %876 = vsyncadd (%p632_p7), %s451_s14, 4294967168  ;;  %s27_s20 = sadd.s32 1, %s899_s20   ;;  %s1124_s28 = sld [smem:[#allocation15_spill]] }
 0x249   : > { %p24_p8 = scmp.ge.s32.totalorder %s27_s20, 10   ;;  %s1125_s17 = sld [smem:[#allocation18_spill]] }
 0x24a   : > { %s1126_s18 = sld [smem:[#allocation16_spill]]  ;;  %s1128_s15 = smov %s883_s16 }
 0x24b   : > { %s1127_s19 = sld [smem:[#allocation17_spill]]  ;;  %26 = sbr.rel (!%p24_p8) target bundleno = 12 (0xc), region = 118 }
 0x24e   : > { %s1129_s16 = smov %s1124_s28 }
 0x250   :  { %457 = vsyncpa [#allocation3], 1 }
 0x251   :  { %459 = vsyncpa [#allocation3 + $0x1], 1 }
 0x252   :  { %460 = vsyncpa [#allocation6], 1 }
 0x253   :  { %462 = vsyncpa [#allocation6 + $0x1], 1 }
 0x254   :  { %463 = vsyncpa [#allocation4], 1 }
 0x255   :  { %465 = vsyncpa [#allocation4 + $0x1], 1 }
 0x256   :  { %466 = vsyncpa [#allocation10], 1 }
 0x257   :  { %468 = vsyncpa [#allocation10 + $0x1], 1 }

</bundles_post_ra>
